<compile_context>
chip_gen: v7x
topology: tpu7x:2x2x1
jax: 0.10.0
libtpu: 0.0.40
codegen_flags: <defaults>
</compile_context>

<pallas_src>
import jax
import jax.numpy as jnp
from jax.experimental import pallas as pl
from jax.experimental.pallas import tpu as pltpu


# ---------------------------------------------------------------------------
# Kernel body
# ---------------------------------------------------------------------------
def _make_kernel(bt, mm_dtype):
    """Per-tile body: relu(W2' @ relu(W1' @ x + c1) + c2 + x) for `bt` batches."""

    def kernel(x_ref, w1_ref, c1_ref, w2_ref, c2_ref, o_ref):
        w1 = w1_ref[...]
        c1 = c1_ref[...]
        w2 = w2_ref[...]
        c2 = c2_ref[...]
        # Static (unrolled) loop over the batch sub-block: each iteration is a
        # plain 2-D MXU matmul on a lane-dense (C, nt) tile; avoids the
        # transpose an 'oc,bcn->bon' einsum would require.
        for i in range(bt):
            x = x_ref[i]
            xf = x if x.dtype == jnp.float32 else x.astype(jnp.float32)
            a = xf if mm_dtype == jnp.float32 else xf.astype(mm_dtype)

            h = jnp.dot(w1, a, preferred_element_type=jnp.float32) + c1
            h = jnp.maximum(h, 0.0)
            hb = h if mm_dtype == jnp.float32 else h.astype(mm_dtype)

            y = jnp.dot(w2, hb, preferred_element_type=jnp.float32) + c2
            # Residual add + final ReLU in f32; cast only at the store.
            o_ref[i] = jnp.maximum(y + xf, 0.0).astype(o_ref.dtype)

    return kernel


# ---------------------------------------------------------------------------
# Hardware queries (safe fallbacks so the wrapper never fails off-TPU)
# ---------------------------------------------------------------------------
def _vmem_capacity_bytes():
    """Physical VMEM per TensorCore; conservative 64 MiB if the query fails."""
    try:
        return int(pltpu.get_tpu_info().vmem_capacity_bytes)
    except Exception:
        return 64 << 20


def _device_kind():
    try:
        return jax.devices()[0].device_kind.lower()
    except Exception:
        return ""


# ---------------------------------------------------------------------------
# Tiling selection
# ---------------------------------------------------------------------------
def _select_tiles(B, C, N, Cm, elt, budget, lane_target):
    """Pick (bt, nt, x_depth, ws_estimate) so the working set fits `budget`."""
    # Lane tile: multiple of 128 and <= N (ragged last tile is masked by the
    # Pallas pipeline), or the full axis when N < 128.  Never a full-N mega tile.
    if N <= 128:
        nt = N
    else:
        nt = min(lane_target, (N // 128) * 128)

    wt_bytes = (2 * C * Cm + C + Cm) * 4  # folded weights/biases

    def ws(bt_, nt_, x_depth, w_depth):
        io = bt_ * C * nt_ * elt                   # one x tile == one out tile
        f32_tmp = bt_ * (2 * C + Cm) * nt_ * 4     # xf / h / y temporaries
        return x_depth * io + 2 * io + w_depth * wt_bytes + f32_tmp

    # Shrink the lane tile (never below 128) until the bt=1 working set fits.
    while nt > 128 and ws(1, nt, 2, 2) > budget:
        nt -= 128

    # Block several batches per grid step when tiles are small, so each DMA is
    # big enough to amortize per-step overhead and keep HBM busy.
    bt = 1
    if B > 1:
        bt = max(1, min(B, 8, (512 << 10) // max(1, C * nt * elt)))
        while bt > 1 and ws(bt, nt, 2, 2) > budget:
            bt -= 1
        # Keep >= 2 "parallel" grid steps so both v7x TensorCores get work.
        while bt > 1 and pl.cdiv(B, bt) * pl.cdiv(N, nt) < 2:
            bt -= 1

    # Deepen the x pipeline only if single-buffered weights leave room for it.
    x_depth = 3 if ws(bt, nt, 3, 1) <= budget else 2

    # Working-set estimate covering both the fancy and the fallback buffering.
    ws_est = max(ws(bt, nt, x_depth, 1), ws(bt, nt, 2, 2))
    return bt, nt, x_depth, ws_est


# ---------------------------------------------------------------------------
# Wrapper
# ---------------------------------------------------------------------------
def conv_bn_relu_res1d(x, params, *, lane_tile=None, bf16_matmul=None):
    """Forward pass of ConvBNReLURes1D. x: [B, C, N]; params from make_params."""
    B, C, N = x.shape
    Cm = params["w1"].shape[0]
    elt = jnp.dtype(x.dtype).itemsize

    # --- generation-aware VMEM budget --------------------------------------
    vmem_cap = _vmem_capacity_bytes()              # 64 MiB v7x, 128 MiB v5e/v6e
    budget = max(vmem_cap - (8 << 20), 16 << 20)   # ~8 MiB compiler headroom
    if lane_tile is None:
        lane_tile = 2048 if vmem_cap >= (96 << 20) else 1024

    # --- v5e flips MXU-bound around Cm~512: run the matmuls in bf16 there ---
    if bf16_matmul is None:
        kind = _device_kind()
        bf16_matmul = Cm >= 512 and ("v5e" in kind or "v5 lite" in kind or "v5lite" in kind)
    mm_dtype = jnp.bfloat16 if bf16_matmul else jnp.float32

    # --- fold eval-mode BatchNorm into the 1x1 convs:  W' = s*W,  c = s*b + t
    w1 = (params["s1"] * params["w1"]).astype(mm_dtype)                     # (Cm, C)
    c1 = (params["s1"] * params["b1"] + params["t1"]).astype(jnp.float32)   # (Cm, 1)
    w2 = (params["s2"] * params["w2"]).astype(mm_dtype)                     # (C, Cm)
    c2 = (params["s2"] * params["b2"] + params["t2"]).astype(jnp.float32)   # (C, 1)

    bt, nt, x_depth, ws_est = _select_tiles(B, C, N, Cm, elt, budget, lane_tile)
    grid = (pl.cdiv(B, bt), pl.cdiv(N, nt))

    cost = pl.CostEstimate(
        flops=4 * B * N * C * Cm,
        transcendentals=0,
        bytes_accessed=int(2 * B * C * N * elt + (2 * C * Cm + C + Cm) * 4),
    )
    # Always set an explicit scoped-VMEM limit (v5e's default is only 16 MiB),
    # clamped below physical VMEM so it can never exceed v7x's 64 MiB.
    vmem_limit = int(min(budget, max(ws_est * 3 // 2 + (2 << 20), 32 << 20)))
    cp = pltpu.CompilerParams(
        dimension_semantics=("parallel", "parallel"),
        vmem_limit_bytes=vmem_limit,
    )

    kernel = _make_kernel(bt, mm_dtype)
    io_map = lambda b, n: (b, 0, n)
    const_map = lambda b, n: (0, 0)

    def build(use_pipeline_mode):
        def spec(shape, imap, bufs):
            if use_pipeline_mode:
                return pl.BlockSpec(shape, imap, pipeline_mode=pl.Buffered(bufs))
            return pl.BlockSpec(shape, imap)

        return pl.pallas_call(
            kernel,
            out_shape=jax.ShapeDtypeStruct((B, C, N), x.dtype),
            grid_spec=pltpu.PrefetchScalarGridSpec(
                num_scalar_prefetch=0,
                grid=grid,
                in_specs=[
                    spec((bt, C, nt), io_map, x_depth),  # streamed activations
                    spec((Cm, C), const_map, 1),         # folded w1 (constant)
                    spec((Cm, 1), const_map, 1),         # folded bias 1
                    spec((C, Cm), const_map, 1),         # folded w2 (constant)
                    spec((C, 1), const_map, 1),          # folded bias 2
                ],
                out_specs=pl.BlockSpec((bt, C, nt), io_map),
            ),
            compiler_params=cp,
            cost_estimate=cost,
        )

    # pipeline_mode=Buffered(k) (single-buffered constants, deeper x pipeline)
    # is a pure perf hint; fall back to default double buffering if this JAX
    # build rejects it so the kernel always runs.
    try:
        return build(True)(x, w1, c1, w2, c2)
    except Exception:
        return build(False)(x, w1, c1, w2, c2)


# ---------------------------------------------------------------------------
# Parameters / reference
# ---------------------------------------------------------------------------
def make_params(key, channel, res_expansion=1.0, eps=1e-5):
    """Deterministic synthetic parameters (BatchNorm in eval mode, as scale/shift)."""
    Cm = int(channel * res_expansion)
    ks = jax.random.split(key, 10)

    # Conv1d weights (kernel_size=1) -> 2-D matrices
    w1 = jax.random.normal(ks[0], (Cm, channel), jnp.float32) * 0.1
    b1 = jax.random.normal(ks[1], (Cm, 1), jnp.float32) * 0.1
    w2 = jax.random.normal(ks[2], (channel, Cm), jnp.float32) * 0.1
    b2 = jax.random.normal(ks[3], (channel, 1), jnp.float32) * 0.1

    # BatchNorm1d running stats + affine, folded to scale/shift
    g1 = 1.0 + 0.1 * jax.random.normal(ks[4], (Cm, 1), jnp.float32)
    be1 = 0.1 * jax.random.normal(ks[5], (Cm, 1), jnp.float32)
    mu1 = 0.1 * jax.random.normal(ks[6], (Cm, 1), jnp.float32)
    var1 = jnp.abs(jax.random.normal(ks[7], (Cm, 1), jnp.float32)) + 0.5

    g2 = 1.0 + 0.1 * jax.random.normal(ks[8], (channel, 1), jnp.float32)
    be2 = 0.1 * jax.random.normal(ks[9], (channel, 1), jnp.float32)
    mu2 = jnp.zeros((channel, 1), jnp.float32)
    var2 = jnp.ones((channel, 1), jnp.float32)

    s1 = g1 / jnp.sqrt(var1 + eps)
    t1 = be1 - mu1 * s1
    s2 = g2 / jnp.sqrt(var2 + eps)
    t2 = be2 - mu2 * s2

    return dict(w1=w1, b1=b1, s1=s1, t1=t1, w2=w2, b2=b2, s2=s2, t2=t2)


def reference(x, p):
    """Plain-JAX reference (unfolded conv -> BN -> relu ... + residual relu)."""
    h = jnp.einsum("oc,bcn->bon", p["w1"], x) + p["b1"][None]
    h = jnp.maximum(h * p["s1"][None] + p["t1"][None], 0.0)
    y = jnp.einsum("oc,bcn->bon", p["w2"], h) + p["b2"][None]
    y = y * p["s2"][None] + p["t2"][None]
    return jnp.maximum(y + x, 0.0)


if __name__ == "__main__":
    # Small shapes consistent with the module: x is [batch, channel, n_points]
    B, C, N = 2, 32, 256
    key = jax.random.PRNGKey(0)
    kx, kp = jax.random.split(key)

    x = jax.random.normal(kx, (B, C, N), jnp.float32)
    params = make_params(kp, channel=C, res_expansion=1.0)

    out = conv_bn_relu_res1d(x, params)
    out = jax.block_until_ready(out)

    ref = reference(x, params)
    assert out.shape == (B, C, N)
    assert jnp.allclose(out, ref, atol=1e-4, rtol=1e-4)

    print("KERNEL_OK")
</pallas_src>

<mosaic_0001>
module attributes {stable_mosaic.version = 11 : i64} {
  func.func @kernel(%arg0: i32, %arg1: i32, %arg2: memref<1x32x256xf32, #tpu.memory_space<vmem>>, %arg3: memref<32x32xf32, #tpu.memory_space<vmem>>, %arg4: memref<32x1xf32, #tpu.memory_space<vmem>>, %arg5: memref<32x32xf32, #tpu.memory_space<vmem>>, %arg6: memref<32x1xf32, #tpu.memory_space<vmem>>, %arg7: memref<1x32x256xf32, #tpu.memory_space<vmem>>) attributes {dimension_semantics = [#tpu.dimension_semantics<parallel>, #tpu.dimension_semantics<parallel>], iteration_bounds = array<i64: 2, 1>, scalar_prefetch = 0 : i64, scratch_operands = 0 : i64, tpu.core_type = #tpu.core_type<tc>, window_params = [{transform_indices = @transform_0, window_bounds = array<i64: 1, 32, 256>}, {pipeline_mode = #tpu.pipeline_mode<synchronous>, transform_indices = @transform_1, window_bounds = array<i64: 32, 32>}, {pipeline_mode = #tpu.pipeline_mode<synchronous>, transform_indices = @transform_2, window_bounds = array<i64: 32, 1>}, {pipeline_mode = #tpu.pipeline_mode<synchronous>, transform_indices = @transform_3, window_bounds = array<i64: 32, 32>}, {pipeline_mode = #tpu.pipeline_mode<synchronous>, transform_indices = @transform_4, window_bounds = array<i64: 32, 1>}, {transform_indices = @transform_5, window_bounds = array<i64: 1, 32, 256>}]} {
    %c0 = arith.constant 0 : index
    %c0_0 = arith.constant 0 : index
    %0 = vector.load %arg3[%c0, %c0_0] : memref<32x32xf32, #tpu.memory_space<vmem>>, vector<32x32xf32>
    %c0_1 = arith.constant 0 : index
    %c0_2 = arith.constant 0 : index
    %1 = vector.load %arg4[%c0_1, %c0_2] : memref<32x1xf32, #tpu.memory_space<vmem>>, vector<32x1xf32>
    %c0_3 = arith.constant 0 : index
    %c0_4 = arith.constant 0 : index
    %2 = vector.load %arg5[%c0_3, %c0_4] : memref<32x32xf32, #tpu.memory_space<vmem>>, vector<32x32xf32>
    %c0_5 = arith.constant 0 : index
    %c0_6 = arith.constant 0 : index
    %3 = vector.load %arg6[%c0_5, %c0_6] : memref<32x1xf32, #tpu.memory_space<vmem>>, vector<32x1xf32>
    %c0_7 = arith.constant 0 : index
    %c0_8 = arith.constant 0 : index
    %c0_9 = arith.constant 0 : index
    %4 = vector.load %arg2[%c0_7, %c0_8, %c0_9] : memref<1x32x256xf32, #tpu.memory_space<vmem>>, vector<1x32x256xf32>
    %5 = vector.shape_cast %4 : vector<1x32x256xf32> to vector<32x256xf32>
    %cst = arith.constant dense<0.000000e+00> : vector<32x256xf32>
    %6 = tpu.matmul %0, %5, %cst {dimension_numbers = #tpu.dot_dimension_numbers<[1], [0], [0], [1], [0, 0, 1, 1], [], []>} : vector<32x32xf32>, vector<32x256xf32>, vector<32x256xf32> -> vector<32x256xf32>
    %7 = vector.broadcast %1 : vector<32x1xf32> to vector<32x256xf32>
    %8 = arith.addf %6, %7 : vector<32x256xf32>
    %cst_10 = arith.constant 0.000000e+00 : f32
    %9 = vector.broadcast %cst_10 : f32 to vector<32x256xf32>
    %10 = arith.maximumf %8, %9 : vector<32x256xf32>
    %cst_11 = arith.constant dense<0.000000e+00> : vector<32x256xf32>
    %11 = tpu.matmul %2, %10, %cst_11 {dimension_numbers = #tpu.dot_dimension_numbers<[1], [0], [0], [1], [0, 0, 1, 1], [], []>} : vector<32x32xf32>, vector<32x256xf32>, vector<32x256xf32> -> vector<32x256xf32>
    %12 = vector.broadcast %3 : vector<32x1xf32> to vector<32x256xf32>
    %13 = arith.addf %11, %12 : vector<32x256xf32>
    %14 = arith.addf %13, %5 : vector<32x256xf32>
    %cst_12 = arith.constant 0.000000e+00 : f32
    %15 = vector.broadcast %cst_12 : f32 to vector<32x256xf32>
    %16 = arith.maximumf %14, %15 : vector<32x256xf32>
    %c0_13 = arith.constant 0 : index
    %c0_14 = arith.constant 0 : index
    %c0_15 = arith.constant 0 : index
    %17 = vector.load %arg7[%c0_13, %c0_14, %c0_15] : memref<1x32x256xf32, #tpu.memory_space<vmem>>, vector<1x32x256xf32>
    %18 = vector.shape_cast %17 : vector<1x32x256xf32> to vector<32x256xf32>
    %19 = vector.shape_cast %16 : vector<32x256xf32> to vector<1x32x256xf32>
    tpu.vector_store %arg7[%c0_13, %c0_14, %c0_15], %19 {strides = array<i32>} : memref<1x32x256xf32, #tpu.memory_space<vmem>>, vector<1x32x256xf32>,
    return
  }
  func.func @transform_0(%arg0: i32, %arg1: i32) -> (i32, i32, i32) {
    %c0_i32 = arith.constant 0 : i32
    %c0_i32_0 = arith.constant 0 : i32
    return %arg0, %c0_i32, %arg1 : i32, i32, i32
  }
  func.func @transform_1(%arg0: i32, %arg1: i32) -> (i32, i32) {
    %c0_i32 = arith.constant 0 : i32
    %c0_i32_0 = arith.constant 0 : i32
    %c0_i32_1 = arith.constant 0 : i32
    return %c0_i32, %c0_i32_0 : i32, i32
  }
  func.func @transform_2(%arg0: i32, %arg1: i32) -> (i32, i32) {
    %c0_i32 = arith.constant 0 : i32
    %c0_i32_0 = arith.constant 0 : i32
    %c0_i32_1 = arith.constant 0 : i32
    return %c0_i32, %c0_i32_0 : i32, i32
  }
  func.func @transform_3(%arg0: i32, %arg1: i32) -> (i32, i32) {
    %c0_i32 = arith.constant 0 : i32
    %c0_i32_0 = arith.constant 0 : i32
    %c0_i32_1 = arith.constant 0 : i32
    return %c0_i32, %c0_i32_0 : i32, i32
  }
  func.func @transform_4(%arg0: i32, %arg1: i32) -> (i32, i32) {
    %c0_i32 = arith.constant 0 : i32
    %c0_i32_0 = arith.constant 0 : i32
    %c0_i32_1 = arith.constant 0 : i32
    return %c0_i32, %c0_i32_0 : i32, i32
  }
  func.func @transform_5(%arg0: i32, %arg1: i32) -> (i32, i32, i32) {
    %c0_i32 = arith.constant 0 : i32
    %c0_i32_0 = arith.constant 0 : i32
    return %arg0, %c0_i32, %arg1 : i32, i32, i32
  }
}

</mosaic_0001>

<bundles_post_ra>
// kernel: tpu_custom_call.1
= control target key start
LH: loop header
LB: loop body
LE: loop exit
PB: predicated region body
PF: predicated region fallthrough
CT: control target
= control target key end

     0   :  { %10 = vsyncpa [#allocation3], 0  ;;  %s1214_s0 = inlined_call_operand.hbm [shape: f32[2,32,256], index: 0, kind: input, shape index: {}]   ;;  %s1215_s1 = inlined_call_operand.vmem [shape: f32[32,32], index: 1, kind: input, shape index: {}]   ;;  %s1216_s2 = inlined_call_operand.vmem [shape: f32[32,1], index: 2, kind: input, shape index: {}]   ;;  %s1217_s3 = inlined_call_operand.vmem [shape: f32[32,32], index: 3, kind: input, shape index: {}]   ;;  %s1218_s4 = inlined_call_operand.vmem [shape: f32[32,1], index: 4, kind: input, shape index: {}]   ;;  %s1219_s5 = inlined_call_operand.hbm [shape: f32[2,32,256], index: 5, kind: output, shape index: {}]  }
   0x1   :  { %12 = vsyncpa [#allocation3 + $0x1], 0 }
   0x2   :  { %13 = vsyncpa [#allocation4], 0 }
   0x3   :  { %15 = vsyncpa [#allocation4 + $0x1], 0  ;;  %s928_s18 = smov 0   ;;  %s930_s19 = smov 0  }
   0x4   :  { %s932_s20 = smov 0   ;;  %s934_s21 = smov 0  }
   0x5   :  { %s936_s22 = smov 0   ;;  %s938_s23 = smov 0  }
   0x6 LB: > { %s665_s24 = sadd.s32 4294967295, %s888_s23   ;;  %s666_s25 = sadd.s32 4294967294, %s888_s23   ;;  %s888_s23 = sphi %s938_s23, %s21_s23   ;;  %s884_s22 = sphi %s936_s22, %s1234_s22   ;;  %s880_s21 = sphi %s934_s21, %s1233_s21   ;;  %s876_s20 = sphi %s932_s20, %s1232_s20   ;;  %s872_s19 = sphi %s930_s19, %s1231_s19   ;;  %s868_s18 = sphi %s928_s18, %s1230_s18  }
   0x7   : > { %s33_s26 = sadd.s32 1, %s884_s22  ;;  %s42_s27 = sadd.s32 1, %s876_s20 }
   0x8   : > { %p35_p0 = scmp.ge.s32.totalorder %s33_s26, 2  ;;  %p49_p1 = scmp.ne.s32.totalorder %s876_s20, %s872_s19 }
   0x9   : > { %p50_p2 = scmp.eq.s32.totalorder %s888_s23, 0  ;;  %p55_p3 = scmp.ne.s32.totalorder %s872_s19, %s868_s18 }
   0xa   : > { %s1236_s26 = smov (%p35_p0, %s33_s26), 0  ;;  %p56_p5 = scmp.eq.s32.totalorder %s665_s24, 0 }
   0xb   : > { %p969_p4 = por %p50_p2, %p49_p1  ;;  %s37_s29 = ssub.s32 %s884_s22, %s1236_s26 }
   0xc   : > { %p165_p6 = scmp.eq.s32.totalorder %s665_s24, 1  ;;  %p40_p7 = scmp.eq.s32.totalorder %s37_s29, 0 }
   0xd   : > { %p975_p8 = por %p56_p5, %p55_p3  ;;  %p171_p10 = scmp.eq.s32.totalorder %s666_s25, 1 }
   0xe   : > { %p979_p9 = por %p165_p6, %p49_p1  ;;  %p718_p13 = scmp.lt.s32.totalorder %s888_s23, 2 }
   0xf   : > { %s984_s7 = scalar_select %p40_p7, %s876_s20, %s42_s27  }
  0x10   : > { %s1223_s6 = scalar_select %p979_p9, 1, 0 }
  0x11   : > { %p986_p11 = por %p171_p10, %p55_p3  ;;  %s203_s9 = sand.u32 1, %s876_s20  }
  0x12   : > { %s669_s10 = sshll.u32 %s203_s9, 6  ;;  %s688_s11 = sshll.u32 %s884_s22, 10 }
  0x13   : > { %s1224_s8 = scalar_select %p986_p11, 1, 0 }
  0x14   : > { %s997_s14 = scalar_lea.hbm %s1214_s0, %s688_s11  ;;  %s207_s15 = scalar_lea.vmem [#allocation2], %s669_s10 }
  0x15   : > { %s216_s16 = sshll.u32 %s207_s15, 4  ;;  %p1003_p0 = pnand %p718_p13, %p969_p4  ;;  %s999_s16 = int_to_ptr.vmem [resolvable:$true] %s216_s16 }
  0x16   : > { %s1008_s24 = scalar_lea.sflag [#allocation3], %s203_s9  ;;  %s776_s25 = scalar_lea.hbm %s997_s14, 1024 }
  0x17   : > { %p777_p2 = scmp.ne.s32.totalorder %s997_s14, %s776_s25  ;;  %p778_p3 = pneg %p1003_p0 }
  0x18   : > { %s781_s28 = scalar_lea.hbm %s1214_s0, 2048  ;;  %p782_p4 = scmp.lt.u32.totalorder %s997_s14, %s1214_s0 }
  0x19   : > { %p779_p5 = pnand %p778_p3, %p777_p2  ;;  %p783_p7 = scmp.lt.u32.totalorder %s781_s28, %s776_s25 }
  0x1a   : > { %p785_p13 = scmp.lt.u32.totalorder %s776_s25, %s997_s14 }
  0x1b   : > { %p780_p6 = pneg %p779_p5  ;;  %p784_p10 = por %p783_p7, %p782_p4 }
  0x1d   : > { %p786_p12 = por %p785_p13, %p784_p10 }
  0x1f   : > { %p787_p1 = pnand %p786_p12, %p780_p6 }
  0x21   : > { %790 = shalt.err (!%p787_p1)
}
  0x22   : > { %s791_s9 = scalar_lea.vmem %s999_s16, 1024  ;;  %s890_s12 = smov [#allocation2]  }
  0x23   : > { %p792_p2 = scmp.ne.s32.totalorder %s999_s16, %s791_s9  ;;  %s796_s13 = sshll.u32 %s890_s12, 4  ;;  %s797_s13 = int_to_ptr.vmem [resolvable:$false] %s796_s13 }
  0x24   : > { %s798_s15 = scalar_lea.vmem %s797_s13, 2048  ;;  %p799_p9 = scmp.lt.s32.totalorder %s999_s16, %s797_s13 }
  0x25   : > { %p794_p5 = pnand %p792_p2, %p778_p3  ;;  %p800_p4 = scmp.lt.s32.totalorder %s798_s15, %s791_s9 }
  0x27   : > { %p795_p11 = pneg %p794_p5  ;;  %p801_p7 = por %p800_p4, %p799_p9 }
  0x29   : > { %p802_p10 = pnand %p801_p7, %p795_p11 }
  0x2b   : > { %805 = shalt.err (!%p802_p10)
}
  0x2c   : > { %s891_s25 = smov 256   ;;  %s892_s27 = smov 16  }
  0x2d   : > { %713 = dma.hbm_to_vmem [thread:$0]  (!%p1003_p0), %s997_s14, 1024, %s999_s16, %s1008_s24, %s891_s25, %s891_s25, %s892_s27  }
  0x2e   : > { %p224_p12 = scmp.lt.s32.totalorder %s888_s23, 3  ;;  %p1226_p1 = scmp.ge.s32.totalorder %s888_s23, 1 }
  0x30   : > { %p225_p3 = pnand %p1226_p1, %p224_p12 }
  0x31   : > { %s1040_s29 = sand.u32 (!%p225_p3), 1, %s872_s19  }
  0x32   : > { %228 = sbr.rel (%p225_p3) target bundleno = 550 (0x226), region = 40  ;;  %s673_s28 = sshll.u32 (!%p225_p3), %s1040_s29, 6 }
  0x33   : > { %s231_s10 = scalar_lea.sflag (!%p225_p3), [#allocation3], %s1040_s29  ;;  %s234_s11 = scalar_lea.vmem (!%p225_p3), [#allocation2], %s673_s28 }
  0x39   : > { %859 = dma.done.wait (%p975_p8), %s231_s10, 1024  }
  0x3a   : > { %861 = vsyncadd (%p975_p8), %s231_s10, 4294966272  ;;  %v893_v0 = vmov 0.0   ;;  %v894_v1 = vmov 0   ;;  %v1052_v2 = vld [vmem:[%s234_s11 + $0x8] sm:$0xff]  ;;  %v1054_v3 = vld [vmem:[%s234_s11 + $0x18] sm:$0xff]  ;;  %vm307_vm0 = vcmask 261120  }
  0x3b   : > { %384 = vmatprep.mubr.f32.mxu0 %v893_v0  ;;  %774 = vset.pattern.permute.xlu0 %v894_v1  ;;  %v1056_v4 = vld [vmem:[%s234_s11] sm:$0xff]  ;;  %v690_v5 = vpack.c.bf16 %v1054_v3, %v1052_v2  ;;  %v1060_v6 = vld [vmem:[%s234_s11 + $0x10] sm:$0xff]  ;;  %v1062_v7 = vld [vmem:[%s234_s11 + $0x28] sm:$0xff]  ;;  %s1142_s12 = scalar_lea.vmem [#allocation5], %s673_s28  ;;  %s689_s13 = sshll.u32 %s880_s21, 10 }
  0x3c   : > { %775 = vset.pattern.permute.xlu1 %v894_v1  ;;  %513 = vmatprep.mubr.f32.mxu1 %v893_v0  ;;  %v1064_v8 = vld [vmem:[%s234_s11 + $0x38] sm:$0xff]  ;;  %v692_v9 = vpack.c.bf16 %v1060_v6, %v1056_v4  ;;  %v1070_v11 = vld [vmem:[%s234_s11 + $0x20] sm:$0xff]  ;;  %v1072_v12 = vld [vmem:[%s234_s11 + $0x30] sm:$0xff]  ;;  %s578_s28 = sshll.u32 %s1142_s12, 4  ;;  %s1163_s27 = scalar_lea.hbm %s1219_s5, %s689_s13  ;;  %s1156_s28 = int_to_ptr.vmem [resolvable:$true] %s578_s28 }
  0x3d   : > { %v694_v10 = vpack.c.bf16 %v1064_v8, %v1062_v7  ;;  %691 = vmatprep.subr.bf16.mxu0 %v690_v5  ;;  %v696_v13 = vpack.c.bf16 %v1072_v12, %v1070_v11  ;;  %v267_v14 = vld [vmem:[%s1216_s2] sm:$0xff]  ;;  %v269_v15 = vld [vmem:[%s1216_s2 + $0x10] sm:$0xff]  ;;  %v268_v16 = vld [vmem:[%s1216_s2 + $0x8] sm:$0xff]  ;;  %s563_s21 = scalar_lea.sflag [#allocation4], %s1040_s29  ;;  %s806_s10 = scalar_lea.vmem %s1156_s28, 1024 }
  0x3e   : > { %693 = vmatpush1.bf16.msra.mxu0 %v692_v9  ;;  %289 = vperm.xlu0 %774, %v267_v14   ;;  %v270_v17 = vld [vmem:[%s1216_s2 + $0x18] sm:$0xff]  ;;  %v263_v18 = vld [vmem:[%s1215_s1] sm:$0xff]  ;;  %v276_v20 = vld [vmem:[%s1218_s4 + $0x8] sm:$0xff]  ;;  %p807_p8 = scmp.ne.s32.totalorder %s1156_s28, %s806_s10  ;;  %p1227_p9 = scmp.ne.s32.totalorder %s1223_s6, 0 }
  0x3f   : > { %695 = vmatprep.subr.bf16.mxu0 %v694_v10  ;;  %299 = vperm.xlu1 %775, %v269_v15   ;;  %v275_v19 = vld [vmem:[%s1218_s4] sm:$0xff]  ;;  %v264_v21 = vld [vmem:[%s1215_s1 + $0x8] sm:$0xff]  ;;  %v277_v22 = vld [vmem:[%s1218_s4 + $0x10] sm:$0xff]  ;;  %s895_s11 = smov [#allocation5]  }
  0x40   : > { %v278_v23 = vld [vmem:[%s1218_s4 + $0x18] sm:$0xff]  ;;  %v265_v24 = vld [vmem:[%s1215_s1 + $0x10] sm:$0xff]  ;;  %v271_v58 = vld [vmem:[%s1217_s3] sm:$0xff]  ;;  %p808_p11 = pnand %p807_p8, %p1227_p9  ;;  %s810_s30 = sshll.u32 %s895_s11, 4  ;;  %s811_s30 = int_to_ptr.vmem [resolvable:$false] %s810_s30 }
  0x41   : > { %v266_v25 = vld [vmem:[%s1215_s1 + $0x18] sm:$0xff]  ;;  %v272_v59 = vld [vmem:[%s1217_s3 + $0x8] sm:$0xff]  ;;  %v273_v60 = vld [vmem:[%s1217_s3 + $0x10] sm:$0xff]  ;;  %s812_s14 = scalar_lea.vmem %s811_s30, 2048  ;;  %p813_p6 = scmp.lt.s32.totalorder %s1156_s28, %s811_s30 }
  0x42   : > { %697 = vmatpush1.bf16.msra.mxu0 %v696_v13  ;;  %294 = vperm.xlu0 %774, %v268_v16   ;;  %v274_v61 = vld [vmem:[%s1217_s3 + $0x18] sm:$0xff]  ;;  %p809_p0 = pneg %p808_p11  ;;  %p814_p13 = scmp.lt.s32.totalorder %s812_s14, %s806_s10 }
  0x43   : > { %304 = vperm.xlu1 %775, %v270_v17  }
  0x44   : > { %p815_p2 = por %p814_p13, %p813_p6 }
  0x45   : > { %675 = vmatmul.mubr.msk.f32.vlgmr.msra.gmra.mrb[0].mxu0 %vm307_vm0, %v263_v18 }
  0x46   : > { %390 = vmatprep.mubr.f32.mxu0 %v893_v0  ;;  %419 = vperm.xlu0 %774, %v275_v19   ;;  %p816_p5 = pnand %p815_p2, %p809_p0 }
  0x47   : > { %424 = vperm.xlu1 %775, %v276_v20  }
  0x49   : > { %676 = vmatmul.mubr.msk.f32.gmra.mrb[2].mxu0 %vm307_vm0, %v264_v21 }
  0x4a   : > { %396 = vmatprep.mubr.f32.mxu0 %v893_v0  ;;  %429 = vperm.xlu0 %774, %v277_v22  }
  0x4b   : > { %434 = vperm.xlu1 %775, %v278_v23  }
  0x4d   : > { %677 = vmatmul.mubr.msk.f32.gmra.mrb[4].mxu0 %vm307_vm0, %v265_v24 }
  0x4e   : > { %402 = vmatprep.mubr.f32.mxu0 %v893_v0 }
  0x51   : > { %678 = vmatmul.mubr.msk.f32.gmra.mrb[6].mxu0 %vm307_vm0, %v266_v25 }
  0xbd   : > { %v290_v26 = vpop.permute.xlu0 %289 }
  0xbe   : > { %v300_v35 = vpop.permute.xlu1 %299 }
  0xc1   : > { %v295_v30 = vpop.permute.xlu0 %294 }
  0xc2   : > { %v305_v46 = vpop.permute.xlu1 %304 }
  0xc5   : > { %v420_v62 = vpop.permute.xlu0 %419 }
  0xc6   : > { %v425_v13 = vpop.permute.xlu1 %424 }
 0x118   : > { %v386_v27 = vpop.f32.mrb[0].mxu0 }
 0x119   : > { %v388_v28 = vpop.f32.mrb[1].mxu0  ;;  %v387_v29 = vadd.f32 %v386_v27, %v290_v26 }
 0x11a   : > { %v389_v31 = vadd.f32 %v388_v28, %v290_v26  ;;  %v435_v28 = vpop.permute.xlu1 %434 }
 0x11b   : > { %v409_v37 = vmax.f32 %v387_v29, 0.0 }
 0x11c   : > { %v392_v32 = vpop.f32.mrb[2].mxu0  ;;  %v410_v39 = vmax.f32 %v389_v31, 0.0 }
 0x11d   : > { %v393_v33 = vadd.f32 %v392_v32, %v295_v30  ;;  %v394_v34 = vpop.f32.mrb[3].mxu0 }
 0x11e   : > { %v395_v36 = vadd.f32 %v394_v34, %v295_v30 }
 0x11f   : > { %v411_v38 = vmax.f32 %v393_v33, 0.0 }
 0x120   : > { %v412_v40 = vmax.f32 %v395_v36, 0.0  ;;  %v398_v41 = vpop.f32.mrb[4].mxu0 }
 0x121   : > { %v400_v42 = vpop.f32.mrb[5].mxu0  ;;  %v700_v43 = vpack.c.bf16 %v411_v38, %v409_v37  ;;  %v399_v45 = vadd.f32 %v398_v41, %v300_v35 }
 0x122   : > { %v698_v44 = vpack.c.bf16 %v412_v40, %v410_v39  ;;  %v401_v47 = vadd.f32 %v400_v42, %v300_v35 }
 0x123   : > { %v413_v52 = vmax.f32 %v399_v45, 0.0 }
 0x124   : > { %v404_v48 = vpop.f32.mrb[6].mxu0  ;;  %699 = vmatprep.subr.bf16.mxu1 %v698_v44  ;;  %v414_v54 = vmax.f32 %v401_v47, 0.0 }
 0x125   : > { %v405_v49 = vadd.f32 %v404_v48, %v305_v46  ;;  %v406_v50 = vpop.f32.mrb[7].mxu0  ;;  %701 = vmatpush1.bf16.msra.mxu1 %v700_v43 }
 0x126   : > { %v407_v51 = vadd.f32 %v406_v50, %v305_v46 }
 0x127   : > { %v415_v53 = vmax.f32 %v405_v49, 0.0 }
 0x128   : > { %v416_v55 = vmax.f32 %v407_v51, 0.0 }
 0x129   : > { %v704_v56 = vpack.c.bf16 %v415_v53, %v413_v52 }
 0x12a   : > { %v702_v57 = vpack.c.bf16 %v416_v55, %v414_v54 }
 0x12c   : > { %703 = vmatprep.subr.bf16.mxu1 %v702_v57 }
 0x12d   : > { %705 = vmatpush1.bf16.msra.mxu1 %v704_v56 }
 0x130   : > { %679 = vmatmul.mubr.msk.f32.vlgmr.msra.gmra.mrb[0].mxu1 %vm307_vm0, %v271_v58 }
 0x131   : > { %519 = vmatprep.mubr.f32.mxu1 %v893_v0 }
 0x134   : > { %680 = vmatmul.mubr.msk.f32.gmra.mrb[2].mxu1 %vm307_vm0, %v272_v59 }
 0x135   : > { %525 = vmatprep.mubr.f32.mxu1 %v893_v0 }
 0x138   : > { %681 = vmatmul.mubr.msk.f32.gmra.mrb[4].mxu1 %vm307_vm0, %v273_v60 }
 0x139   : > { %531 = vmatprep.mubr.f32.mxu1 %v893_v0 }
 0x13c   : > { %682 = vmatmul.mubr.msk.f32.gmra.mrb[6].mxu1 %vm307_vm0, %v274_v61 }
 0x203   : > { %v515_v63 = vpop.f32.mrb[0].mxu1 }
 0x204   : > { %v516_v1 = vadd.f32 %v515_v63, %v420_v62  ;;  %v517_v5 = vpop.f32.mrb[1].mxu1 }
 0x205   : > { %v518_v9 = vadd.f32 %v517_v5, %v420_v62 }
 0x206   : > { %v538_v10 = vadd.f32 %v516_v1, %v1056_v4  ;;  %v430_v4 = vpop.permute.xlu0 %429 }
 0x207   : > { %v539_v14 = vadd.f32 %v518_v9, %v1052_v2  ;;  %v521_v15 = vpop.f32.mrb[2].mxu1 }
 0x208   : > { %v546_v16 = vmax.f32 %v538_v10, 0.0  ;;  %v522_v0 = vadd.f32 %v521_v15, %v425_v13  ;;  %v523_v17 = vpop.f32.mrb[3].mxu1 }
 0x209   : > { %v547_v18 = vmax.f32 %v539_v14, 0.0  ;;  %v524_v19 = vadd.f32 %v523_v17, %v425_v13 }
 0x20a   : > { %554 = vst [vmem:[%s1142_s12] sm:$0xff] %v546_v16  ;;  %v540_v20 = vadd.f32 %v522_v0, %v1060_v6 }
 0x20b   : > { %555 = vst [vmem:[%s1142_s12 + $0x8] sm:$0xff] %v547_v18  ;;  %v541_v2 = vadd.f32 %v524_v19, %v1054_v3  ;;  %v527_v21 = vpop.f32.mrb[4].mxu1 }
 0x20c   : > { %v548_v22 = vmax.f32 %v540_v20, 0.0  ;;  %v528_v23 = vadd.f32 %v527_v21, %v430_v4  ;;  %v529_v24 = vpop.f32.mrb[5].mxu1 }
 0x20d   : > { %v549_v25 = vmax.f32 %v541_v2, 0.0  ;;  %v530_v26 = vadd.f32 %v529_v24, %v430_v4 }
 0x20e   : > { %556 = vst [vmem:[%s1142_s12 + $0x10] sm:$0xff] %v548_v22  ;;  %v542_v27 = vadd.f32 %v528_v23, %v1070_v11 }
 0x20f   : > { %557 = vst [vmem:[%s1142_s12 + $0x18] sm:$0xff] %v549_v25  ;;  %v543_v6 = vadd.f32 %v530_v26, %v1062_v7  ;;  %v533_v29 = vpop.f32.mrb[6].mxu1 }
 0x210   : > { %v550_v3 = vmax.f32 %v542_v27, 0.0  ;;  %v534_v30 = vadd.f32 %v533_v29, %v435_v28  ;;  %v535_v31 = vpop.f32.mrb[7].mxu1 }
 0x211   : > { %v551_v32 = vmax.f32 %v543_v6, 0.0  ;;  %v536_v33 = vadd.f32 %v535_v31, %v435_v28 }
 0x212   : > { %558 = vst [vmem:[%s1142_s12 + $0x20] sm:$0xff] %v550_v3  ;;  %v544_v34 = vadd.f32 %v534_v30, %v1072_v12 }
 0x213   : > { %559 = vst [vmem:[%s1142_s12 + $0x28] sm:$0xff] %v551_v32  ;;  %v545_v7 = vadd.f32 %v536_v33, %v1064_v8 }
 0x214   : > { %v552_v11 = vmax.f32 %v544_v34, 0.0 }
 0x215   : > { %v553_v35 = vmax.f32 %v545_v7, 0.0 }
 0x216   : > { %560 = vst [vmem:[%s1142_s12 + $0x30] sm:$0xff] %v552_v11 }
 0x217   : > { %561 = vst [vmem:[%s1142_s12 + $0x38] sm:$0xff] %v553_v35 }
 0x218   : > { %819 = shalt.err (!%p816_p5)
}
 0x219   : > { %s820_s16 = scalar_lea.hbm %s1163_s27, 1024  ;;  %s824_s9 = scalar_lea.hbm %s1219_s5, 2048 }
 0x21a   : > { %p821_p4 = scmp.ne.s32.totalorder %s1163_s27, %s820_s16  ;;  %p825_p12 = scmp.lt.u32.totalorder %s1163_s27, %s1219_s5 }
 0x21b   : > { %p826_p1 = scmp.lt.u32.totalorder %s824_s9, %s820_s16  ;;  %p828_p8 = scmp.lt.u32.totalorder %s820_s16, %s1163_s27 }
 0x21c   : > { %p822_p7 = pnand %p821_p4, %p1227_p9 }
 0x21d   : > { %p827_p3 = por %p826_p1, %p825_p12 }
 0x21e   : > { %p823_p10 = pneg %p822_p7 }
 0x21f   : > { %p829_p11 = por %p828_p8, %p827_p3 }
 0x221   : > { %p830_p0 = pnand %p829_p11, %p823_p10 }
 0x223   : > { %833 = shalt.err (!%p830_p0)
}
 0x224   : > { %s896_s15 = smov 256   ;;  %s897_s25 = smov 16  }
 0x225   : > { %708 = dma.vmem_to_hbm [thread:$0]  (%p1227_p9), %s1156_s28, 1024, %s1163_s27, %s563_s21, %s896_s15, %s896_s15, %s897_s25  }
 0x226 PF: > { %s593_s10 = sand.u32 1, %s868_s18   ;;  %p1228_p6 = scmp.ne.s32.totalorder %s1224_s8, 0 }
 0x227   : > { %p1229_p13 = scmp.ge.s32.totalorder %s888_s23, 2  ;;  %s594_s11 = scalar_lea.sflag [#allocation4], %s593_s10 }
 0x229   : > { %p715_p2 = pnand %p1229_p13, %p1228_p6 }
 0x22b   : > { %863 = dma.done.wait (!%p715_p2), %s594_s11, 1024  }
 0x22c   : > { %865 = vsyncadd (!%p715_p2), %s594_s11, 4294966272  ;;  %s21_s23 = sadd.s32 1, %s888_s23   ;;  %s1230_s18 = smov %s872_s19 }
 0x22d   : > { %p18_p5 = scmp.ge.s32.totalorder %s21_s23, 4   ;;  %s1231_s19 = smov %s876_s20 }
 0x22e   : > { %s1232_s20 = smov %s984_s7  ;;  %s1233_s21 = smov %s884_s22 }
 0x22f   : > { %s1234_s22 = smov %s1236_s26  ;;  %20 = sbr.rel (!%p18_p5) target bundleno = 6 (0x6), region = 85 }
 0x236   :  { %599 = vsyncpa [#allocation3], 1 }
 0x237   :  { %601 = vsyncpa [#allocation3 + $0x1], 1 }
 0x238   :  { %602 = vsyncpa [#allocation4], 1 }
 0x239   :  { %604 = vsyncpa [#allocation4 + $0x1], 1 }

</bundles_post_ra>
